<compile_context>
chip_gen: v7x
topology: tpu7x:2x2x1
jax: 0.10.0
libtpu: 0.0.40
codegen_flags: <defaults>
</compile_context>

<pallas_src>
import functools

import jax
import jax.numpy as jnp
from jax import lax
from jax.experimental import pallas as pl
from jax.experimental.pallas import tpu as pltpu


# ---------------------------------------------------------------------------
# Kernels
# ---------------------------------------------------------------------------

def _epilogue(y, w2_ref, b2_ref, o_ref):
    # Context_Gating.fc (MXU, f32 acc) + GLU + L2 normalize (EUP rsqrt).
    g = jnp.dot(y.astype(w2_ref.dtype), w2_ref[...],
                preferred_element_type=jnp.float32) + b2_ref[...]
    z = y * jax.nn.sigmoid(g)                       # F.glu(cat((y, g), 1), 1)
    sumsq = jnp.sum(z * z, axis=-1, keepdims=True)
    inv = lax.rsqrt(jnp.maximum(sumsq, 1e-24))      # == z / max(||z||, 1e-12)
    o_ref[...] = (z * inv).astype(o_ref.dtype)


def geu_kernel(x_ref, w1_ref, b1_ref, w2_ref, b2_ref, o_ref):
    # Resident-weights path. x is cast to the MXU dtype here (hides under DMA).
    y = jnp.dot(x_ref[...].astype(w1_ref.dtype), w1_ref[...],
                preferred_element_type=jnp.float32) + b1_ref[...]
    _epilogue(y, w2_ref, b2_ref, o_ref)


def geu_kernel_ktiled(x_ref, w1_ref, b1_ref, w2_ref, b2_ref, o_ref, acc_ref):
    # K-tiled path: grid = (batch tiles, D_in // tk); W1 streamed in K-slabs,
    # f32 y-accumulator lives in VMEM scratch across the (arbitrary) K axis.
    k = pl.program_id(1)

    @pl.when(k == 0)
    def _init():
        acc_ref[...] = jnp.zeros_like(acc_ref)

    acc_ref[...] += jnp.dot(x_ref[...].astype(w1_ref.dtype), w1_ref[...],
                            preferred_element_type=jnp.float32)

    @pl.when(k == pl.num_programs(1) - 1)
    def _finish():
        y = acc_ref[...] + b1_ref[...]
        _epilogue(y, w2_ref, b2_ref, o_ref)


# ---------------------------------------------------------------------------
# One-time capability / hardware queries (cached; no per-call host syncs)
# ---------------------------------------------------------------------------

@functools.lru_cache(maxsize=None)
def _vmem_capacity_bytes():
    try:
        return int(pltpu.get_tpu_info().vmem_capacity_bytes)
    except Exception:
        return 64 * 1024 * 1024  # conservative fallback (v7x per-TC size)


@functools.lru_cache(maxsize=None)
def _buffered_one_supported():
    """One-time probe: can constant-index operands be single-buffered?"""
    if not hasattr(pl, "Buffered"):
        return False
    try:
        def _probe(x_ref, o_ref):
            o_ref[...] = x_ref[...] * 2.0

        out = pl.pallas_call(
            _probe,
            out_shape=jax.ShapeDtypeStruct((16, 128), jnp.float32),
            grid=(2,),
            in_specs=[pl.BlockSpec((8, 128), lambda i: (0, 0),
                                   pipeline_mode=pl.Buffered(1))],
            out_specs=pl.BlockSpec((8, 128), lambda i: (i, 0)),
        )(jnp.ones((8, 128), jnp.float32))
        jax.block_until_ready(out)
        return True
    except Exception:
        return False


# ---------------------------------------------------------------------------
# Tiling heuristics
# ---------------------------------------------------------------------------

def _sanitize_block(blk, batch):
    blk = max(1, min(int(blk), batch))
    if blk < batch and blk % 8:             # (8,128) rule on the sublane axis
        blk = max(8, (blk // 8) * 8)
    return blk


def _choose_block_b(batch, per_row_bytes, avail_bytes, row_align, max_block=512):
    if batch <= row_align:
        return batch                         # block == full dim -> allowed
    fit = max(row_align, int(avail_bytes // max(per_row_bytes, 1)))
    blk = min(max_block, fit, batch)
    # >= 2 grid steps for DMA/compute overlap; >= 4 for large batches so both
    # v7x TensorCores (megacore "parallel" sharding) still pipeline per core.
    if batch >= 4 * 128:
        blk = min(blk, pl.cdiv(batch, 4))
    elif batch > 2 * row_align:
        blk = min(blk, pl.cdiv(batch, 2))
    blk = max(row_align, (blk // row_align) * row_align)
    return _sanitize_block(blk, batch)


# ---------------------------------------------------------------------------
# Wrapper
# ---------------------------------------------------------------------------

def prepare_geu_params(w1, b1, w2, b2, *, compute_dtype=jnp.float32):
    """One-time parameter conversion — do this OUTSIDE the per-step call path.

    Weights go to the MXU compute dtype, biases to (1, D_out) f32 rows, so the
    kernel call never re-reads/re-writes the weights through HBM per step.
    """
    cd = jnp.dtype(compute_dtype)
    d_out = w1.shape[-1]
    return (w1.astype(cd), b1.reshape(1, d_out).astype(jnp.float32),
            w2.astype(cd), b2.reshape(1, d_out).astype(jnp.float32))


def gated_embedding_unit(x, w1, b1, w2, b2, *, block_b=None,
                         compute_dtype=jnp.float32, out_dtype=None,
                         k_tile=None):
    """Forward pass of Gated_Embedding_Unit as a single fused Pallas kernel.

    x : (B, D_in); w1: (D_in, D_out); b1: (D_out,)|(1,D_out);
    w2: (D_out, D_out); b2: (D_out,)|(1,D_out).   Weights are stored
    pre-transposed relative to nn.Linear so the kernel does row-major matmuls.

    compute_dtype : dtype fed to the MXU. f32 (default) is bit-faithful to the
        torch module; bf16 is the explicit perf opt-in (f32 accumulation and a
        fully-f32 epilogue are kept either way).
    out_dtype     : output storage dtype (default x.dtype); bf16 halves the
        output HBM write if the consumer tolerates it.
    k_tile        : force the K-tiled reduction path with this D_in tile
        (testing / expert knob); it is selected automatically when W1+W2
        residency would blow this chip's VMEM (e.g. large D_in on v7x).
    """
    B, D_in = x.shape
    D_out = w1.shape[-1]
    out_dtype = x.dtype if out_dtype is None else out_dtype
    cd = jnp.dtype(compute_dtype)

    # Only cast if the caller handed raw params (prefer prepare_geu_params).
    w1_c = w1 if w1.dtype == cd else w1.astype(cd)
    w2_c = w2 if w2.dtype == cd else w2.astype(cd)
    b1_2d = b1.reshape(1, D_out).astype(jnp.float32)
    b2_2d = b2.reshape(1, D_out).astype(jnp.float32)

    x_is = jnp.dtype(x.dtype).itemsize
    cd_is = cd.itemsize
    out_is = jnp.dtype(out_dtype).itemsize

    vmem_cap = _vmem_capacity_bytes()
    vmem_budget = int(vmem_cap * 0.85)       # headroom for Mosaic scratch/sems
    row_align = 16 if cd_is < 4 else 8       # bf16 packs 16 rows per vreg

    weight_bufs = 1 if _buffered_one_supported() else 2
    weights_bytes = (D_in * D_out + D_out * D_out) * cd_is

    def _resident_plan():
        resident = weight_bufs * weights_bytes + 2 * D_out * 4
        per_row = (2 * D_in * x_is            # x tile, double buffered (native dtype)
                   + 2 * D_out * out_is       # out tile, double buffered
                   + D_in * cd_is             # in-kernel cast of the x tile
                   + 5 * D_out * 4)           # y / g / z f32 temporaries
        avail = vmem_budget - resident
        if avail < per_row * 8:
            return None
        blk = _sanitize_block(block_b, B) if block_b else _choose_block_b(
            B, per_row, avail, row_align)
        return ("resident", blk, None, resident + per_row * blk)

    def _ktiled_plan():
        base = weight_bufs * D_out * D_out * cd_is + 2 * D_out * 4  # W2 + biases
        cands = (k_tile,) if k_tile else (2048, 1024, 512, 256, 128)
        for tk in cands:
            if not tk or D_in % tk or tk % 128:
                continue
            per_row = (2 * tk * x_is + 2 * D_out * out_is + tk * cd_is
                       + D_out * 4            # f32 y-accumulator scratch
                       + 5 * D_out * 4)
            slab = 2 * tk * D_out * cd_is     # W1 K-slab, double buffered
            avail = vmem_budget - base - slab
            if avail < per_row * 8:
                continue
            blk = _sanitize_block(block_b, B) if block_b else _choose_block_b(
                B, per_row, avail, row_align)
            return ("ktiled", blk, tk, base + slab + per_row * blk)
        return None

    plan = None
    if k_tile is None:
        plan = _resident_plan()
        # W1+W2 residency too big for this chip's VMEM -> stream W1 in K-slabs.
        if plan is not None and weight_bufs * weights_bytes > 0.375 * vmem_cap:
            plan = _ktiled_plan() or plan
    if plan is None or k_tile is not None:
        plan = _ktiled_plan() or plan
    if plan is None:
        # Last resort: smallest resident tile with a raised VMEM limit.
        plan = ("resident", _sanitize_block(row_align, B), None, vmem_budget)

    mode, blk, tk, vmem_needed = plan
    grid_b = pl.cdiv(B, blk)
    rows = grid_b * blk                       # rows actually processed

    cost = pl.CostEstimate(
        flops=int(2 * rows * (D_in * D_out + D_out * D_out) + 6 * rows * D_out),
        transcendentals=int(rows * D_out + rows),     # sigmoid / elem + rsqrt / row
        bytes_accessed=int(rows * D_in * x_is
                           + (D_in * D_out + D_out * D_out) * cd_is
                           + 2 * D_out * 4
                           + rows * D_out * out_is),
    )

    compiler_kwargs = {}
    # Scoped-VMEM defaults: 16 MiB (v5e) / 32 MiB (v6e, v7x). Raise only when
    # the plan needs more, and never past ~85% of this chip's physical VMEM.
    if vmem_needed > 14 * 1024 * 1024:
        compiler_kwargs["vmem_limit_bytes"] = int(
            min(vmem_budget, max(vmem_needed * 5 // 4, 16 * 1024 * 1024)))

    # Constant-index operands never change across the grid -> 1 buffer each.
    wkw = dict(pipeline_mode=pl.Buffered(1)) if weight_bufs == 1 else {}

    if mode == "resident":
        grid = (grid_b,)
        in_specs = [
            pl.BlockSpec((blk, D_in), lambda i: (i, 0)),          # x tile (pipelined)
            pl.BlockSpec((D_in, D_out), lambda i: (0, 0), **wkw),  # W1 (resident)
            pl.BlockSpec((1, D_out), lambda i: (0, 0), **wkw),     # b1
            pl.BlockSpec((D_out, D_out), lambda i: (0, 0), **wkw),  # W2 (resident)
            pl.BlockSpec((1, D_out), lambda i: (0, 0), **wkw),     # b2
        ]
        out_spec = pl.BlockSpec((blk, D_out), lambda i: (i, 0))
        scratch = []
        kernel = geu_kernel
        semantics = ("parallel",)
    else:
        grid = (grid_b, D_in // tk)
        in_specs = [
            pl.BlockSpec((blk, tk), lambda i, k: (i, k)),           # x K-slab
            pl.BlockSpec((tk, D_out), lambda i, k: (k, 0)),         # W1 K-slab
            pl.BlockSpec((1, D_out), lambda i, k: (0, 0), **wkw),   # b1
            pl.BlockSpec((D_out, D_out), lambda i, k: (0, 0), **wkw),  # W2
            pl.BlockSpec((1, D_out), lambda i, k: (0, 0), **wkw),   # b2
        ]
        out_spec = pl.BlockSpec((blk, D_out), lambda i, k: (i, 0))
        scratch = [pltpu.VMEM((blk, D_out), jnp.float32)]           # f32 y-acc
        kernel = geu_kernel_ktiled
        semantics = ("parallel", "arbitrary")

    # NOTE: if profiling shows an epilogue-bound regime on v6e/v7x (small
    # D_out), a bf16 sigmoid variant can be added; deliberately not applied
    # here (and never on v5e, which has no bf16 EUP/VPU path).
    return pl.pallas_call(
        kernel,
        out_shape=jax.ShapeDtypeStruct((B, D_out), out_dtype),
        grid_spec=pltpu.PrefetchScalarGridSpec(
            num_scalar_prefetch=0,
            grid=grid,
            in_specs=in_specs,
            out_specs=out_spec,
            scratch_shapes=scratch),
        compiler_params=pltpu.CompilerParams(
            dimension_semantics=semantics, **compiler_kwargs),
        cost_estimate=cost,
    )(x, w1_c, b1_2d, w2_c, b2_2d)


# ---------------------------------------------------------------------------
# Pure-JAX reference
# ---------------------------------------------------------------------------

def reference(x, w1, b1, w2, b2, *, compute_dtype=jnp.float32):
    cd = compute_dtype
    y = jnp.dot(x.astype(cd), w1.astype(cd),
                preferred_element_type=jnp.float32) + b1
    g = jnp.dot(y.astype(cd), w2.astype(cd),
                preferred_element_type=jnp.float32) + b2
    z = y * jax.nn.sigmoid(g)
    norm = jnp.sqrt(jnp.sum(z * z, axis=-1, keepdims=True))
    return (z / jnp.maximum(norm, 1e-12)).astype(x.dtype)


if __name__ == "__main__":
    B, D_in, D_out = 64, 256, 128

    key = jax.random.PRNGKey(0)
    kx, kw1, kb1, kw2, kb2 = jax.random.split(key, 5)

    x = jax.random.normal(kx, (B, D_in), dtype=jnp.float32)
    # Deterministic synthetic parameters (nn.Linear shapes, stored transposed).
    w1 = jax.random.normal(kw1, (D_in, D_out), dtype=jnp.float32) * (1.0 / D_in ** 0.5)
    b1 = jax.random.normal(kb1, (D_out,), dtype=jnp.float32) * 0.01
    w2 = jax.random.normal(kw2, (D_out, D_out), dtype=jnp.float32) * (1.0 / D_out ** 0.5)
    b2 = jax.random.normal(kb2, (D_out,), dtype=jnp.float32) * 0.01

    ref_f32 = reference(x, w1, b1, w2, b2)

    # 1) Default (f32, bit-faithful) path — resident-weights kernel.
    out = jax.block_until_ready(gated_embedding_unit(x, w1, b1, w2, b2))
    assert out.shape == (B, D_out)
    assert jnp.allclose(out, ref_f32, atol=1e-5, rtol=1e-5)

    # 2) Ragged batch (partial last block): padded rows must not leak.
    xr = x[:50]
    out_r = jax.block_until_ready(gated_embedding_unit(xr, w1, b1, w2, b2))
    assert out_r.shape == (50, D_out)
    assert jnp.allclose(out_r, ref_f32[:50], atol=1e-5, rtol=1e-5)

    # 3) bf16 MXU path (explicit opt-in), params pre-converted once.
    pw1, pb1, pw2, pb2 = prepare_geu_params(w1, b1, w2, b2,
                                            compute_dtype=jnp.bfloat16)
    out_bf = jax.block_until_ready(
        gated_embedding_unit(x, pw1, pb1, pw2, pb2,
                             compute_dtype=jnp.bfloat16))
    ref_bf = reference(x, w1, b1, w2, b2, compute_dtype=jnp.bfloat16)
    assert out_bf.shape == (B, D_out)
    assert jnp.allclose(out_bf, ref_bf, atol=2e-3, rtol=2e-3)
    assert jnp.allclose(out_bf, ref_f32, atol=2e-2, rtol=2e-2)

    # 4) Forced K-tiled reduction path (auto-selected on chips where W1
    #    residency would blow VMEM, e.g. large D_in on v7x's 64 MiB/TC).
    out_k = jax.block_until_ready(
        gated_embedding_unit(x, w1, b1, w2, b2, k_tile=128))
    assert jnp.allclose(out_k, ref_f32, atol=1e-5, rtol=1e-5)

    print("KERNEL_OK")
</pallas_src>

<mosaic_0001>
module attributes {stable_mosaic.version = 11 : i64} {
  func.func @_probe(%arg0: i32, %arg1: memref<8x128xf32, #tpu.memory_space<vmem>>, %arg2: memref<8x128xf32, #tpu.memory_space<vmem>>) attributes {dimension_semantics = [#tpu.dimension_semantics<arbitrary>], iteration_bounds = array<i64: 2>, scalar_prefetch = 0 : i64, scratch_operands = 0 : i64, tpu.core_type = #tpu.core_type<tc>, window_params = [{pipeline_mode = #tpu.pipeline_mode<synchronous>, transform_indices = @transform_0, window_bounds = array<i64: 8, 128>}, {transform_indices = @transform_1, window_bounds = array<i64: 8, 128>}]} {
    %c0 = arith.constant 0 : index
    %c0_0 = arith.constant 0 : index
    %0 = vector.load %arg1[%c0, %c0_0] : memref<8x128xf32, #tpu.memory_space<vmem>>, vector<8x128xf32>
    %cst = arith.constant 2.000000e+00 : f32
    %1 = vector.broadcast %cst : f32 to vector<8x128xf32>
    %2 = arith.mulf %0, %1 : vector<8x128xf32>
    %c0_1 = arith.constant 0 : index
    %c0_2 = arith.constant 0 : index
    %3 = vector.load %arg2[%c0_1, %c0_2] : memref<8x128xf32, #tpu.memory_space<vmem>>, vector<8x128xf32>
    tpu.vector_store %arg2[%c0_1, %c0_2], %2 {strides = array<i32>} : memref<8x128xf32, #tpu.memory_space<vmem>>, vector<8x128xf32>,
    return
  }
  func.func @transform_0(%arg0: i32) -> (i32, i32) {
    %c0_i32 = arith.constant 0 : i32
    %c0_i32_0 = arith.constant 0 : i32
    %c0_i32_1 = arith.constant 0 : i32
    return %c0_i32, %c0_i32_0 : i32, i32
  }
  func.func @transform_1(%arg0: i32) -> (i32, i32) {
    %c0_i32 = arith.constant 0 : i32
    %c0_i32_0 = arith.constant 0 : i32
    return %arg0, %c0_i32 : i32, i32
  }
}

module attributes {stable_mosaic.version = 11 : i64} {
  func.func @geu_kernel(%arg0: i32, %arg1: memref<32x256xf32, #tpu.memory_space<vmem>>, %arg2: memref<256x128xf32, #tpu.memory_space<vmem>>, %arg3: memref<1x128xf32, #tpu.memory_space<vmem>>, %arg4: memref<128x128xf32, #tpu.memory_space<vmem>>, %arg5: memref<1x128xf32, #tpu.memory_space<vmem>>, %arg6: memref<32x128xf32, #tpu.memory_space<vmem>>) attributes {dimension_semantics = [#tpu.dimension_semantics<parallel>], iteration_bounds = array<i64: 2>, scalar_prefetch = 0 : i64, scratch_operands = 0 : i64, tpu.core_type = #tpu.core_type<tc>, window_params = [{transform_indices = @transform_0, window_bounds = array<i64: 32, 256>}, {pipeline_mode = #tpu.pipeline_mode<synchronous>, transform_indices = @transform_1, window_bounds = array<i64: 256, 128>}, {pipeline_mode = #tpu.pipeline_mode<synchronous>, transform_indices = @transform_2, window_bounds = array<i64: 1, 128>}, {pipeline_mode = #tpu.pipeline_mode<synchronous>, transform_indices = @transform_3, window_bounds = array<i64: 128, 128>}, {pipeline_mode = #tpu.pipeline_mode<synchronous>, transform_indices = @transform_4, window_bounds = array<i64: 1, 128>}, {transform_indices = @transform_5, window_bounds = array<i64: 32, 128>}]} {
    %c0 = arith.constant 0 : index
    %c0_0 = arith.constant 0 : index
    %0 = vector.load %arg1[%c0, %c0_0] : memref<32x256xf32, #tpu.memory_space<vmem>>, vector<32x256xf32>
    %c0_1 = arith.constant 0 : index
    %c0_2 = arith.constant 0 : index
    %1 = vector.load %arg2[%c0_1, %c0_2] : memref<256x128xf32, #tpu.memory_space<vmem>>, vector<256x128xf32>
    %cst = arith.constant dense<0.000000e+00> : vector<32x128xf32>
    %2 = tpu.matmul %0, %1, %cst {dimension_numbers = #tpu.dot_dimension_numbers<[1], [0], [0], [1], [0, 0, 1, 1], [], []>} : vector<32x256xf32>, vector<256x128xf32>, vector<32x128xf32> -> vector<32x128xf32>
    %c0_3 = arith.constant 0 : index
    %c0_4 = arith.constant 0 : index
    %3 = vector.load %arg3[%c0_3, %c0_4] : memref<1x128xf32, #tpu.memory_space<vmem>>, vector<1x128xf32>
    %4 = vector.broadcast %3 : vector<1x128xf32> to vector<32x128xf32>
    %5 = arith.addf %2, %4 : vector<32x128xf32>
    %c0_5 = arith.constant 0 : index
    %c0_6 = arith.constant 0 : index
    %6 = vector.load %arg4[%c0_5, %c0_6] : memref<128x128xf32, #tpu.memory_space<vmem>>, vector<128x128xf32>
    %cst_7 = arith.constant dense<0.000000e+00> : vector<32x128xf32>
    %7 = tpu.matmul %5, %6, %cst_7 {dimension_numbers = #tpu.dot_dimension_numbers<[1], [0], [0], [1], [0, 0, 1, 1], [], []>} : vector<32x128xf32>, vector<128x128xf32>, vector<32x128xf32> -> vector<32x128xf32>
    %c0_8 = arith.constant 0 : index
    %c0_9 = arith.constant 0 : index
    %8 = vector.load %arg5[%c0_8, %c0_9] : memref<1x128xf32, #tpu.memory_space<vmem>>, vector<1x128xf32>
    %9 = vector.broadcast %8 : vector<1x128xf32> to vector<32x128xf32>
    %10 = arith.addf %7, %9 : vector<32x128xf32>
    %11 = arith.negf %10 : vector<32x128xf32>
    %12 = math.exp %11 : vector<32x128xf32>
    %cst_10 = arith.constant 1.000000e+00 : f32
    %13 = vector.broadcast %cst_10 : f32 to vector<32x128xf32>
    %14 = arith.addf %13, %12 : vector<32x128xf32>
    %15 = arith.divf %13, %14 : vector<32x128xf32>
    %16 = arith.mulf %5, %15 : vector<32x128xf32>
    %17 = arith.mulf %16, %16 : vector<32x128xf32>
    %cst_11 = arith.constant dense<0.000000e+00> : vector<32xf32>
    %18 = vector.multi_reduction <add>, %17, %cst_11 [1] : vector<32x128xf32> to vector<32xf32>
    %19 = vector.shape_cast %18 : vector<32xf32> to vector<32x1xf32>
    %cst_12 = arith.constant 1.000000e-24 : f32
    %20 = vector.broadcast %cst_12 : f32 to vector<32x1xf32>
    %21 = arith.maximumf %19, %20 : vector<32x1xf32>
    %22 = math.rsqrt %21 : vector<32x1xf32>
    %23 = vector.broadcast %22 : vector<32x1xf32> to vector<32x128xf32>
    %24 = arith.mulf %16, %23 : vector<32x128xf32>
    %c0_13 = arith.constant 0 : index
    %c0_14 = arith.constant 0 : index
    %25 = vector.load %arg6[%c0_13, %c0_14] : memref<32x128xf32, #tpu.memory_space<vmem>>, vector<32x128xf32>
    tpu.vector_store %arg6[%c0_13, %c0_14], %24 {strides = array<i32>} : memref<32x128xf32, #tpu.memory_space<vmem>>, vector<32x128xf32>,
    return
  }
  func.func @transform_0(%arg0: i32) -> (i32, i32) {
    %c0_i32 = arith.constant 0 : i32
    %c0_i32_0 = arith.constant 0 : i32
    return %arg0, %c0_i32 : i32, i32
  }
  func.func @transform_1(%arg0: i32) -> (i32, i32) {
    %c0_i32 = arith.constant 0 : i32
    %c0_i32_0 = arith.constant 0 : i32
    %c0_i32_1 = arith.constant 0 : i32
    return %c0_i32, %c0_i32_0 : i32, i32
  }
  func.func @transform_2(%arg0: i32) -> (i32, i32) {
    %c0_i32 = arith.constant 0 : i32
    %c0_i32_0 = arith.constant 0 : i32
    %c0_i32_1 = arith.constant 0 : i32
    return %c0_i32, %c0_i32_0 : i32, i32
  }
  func.func @transform_3(%arg0: i32) -> (i32, i32) {
    %c0_i32 = arith.constant 0 : i32
    %c0_i32_0 = arith.constant 0 : i32
    %c0_i32_1 = arith.constant 0 : i32
    return %c0_i32, %c0_i32_0 : i32, i32
  }
  func.func @transform_4(%arg0: i32) -> (i32, i32) {
    %c0_i32 = arith.constant 0 : i32
    %c0_i32_0 = arith.constant 0 : i32
    %c0_i32_1 = arith.constant 0 : i32
    return %c0_i32, %c0_i32_0 : i32, i32
  }
  func.func @transform_5(%arg0: i32) -> (i32, i32) {
    %c0_i32 = arith.constant 0 : i32
    %c0_i32_0 = arith.constant 0 : i32
    return %arg0, %c0_i32 : i32, i32
  }
}

</mosaic_0001>

<bundles_post_ra>
// kernel: tpu_custom_call.1
= control target key start
LH: loop header
LB: loop body
LE: loop exit
PB: predicated region body
PF: predicated region fallthrough
CT: control target
= control target key end

     0   :  { %6 = vsyncpa [#allocation3], 0  ;;  %s482_s0 = inlined_call_operand.hbm [shape: f32[8,128], index: 0, kind: input, shape index: {}]   ;;  %s483_s1 = inlined_call_operand.hbm [shape: f32[16,128], index: 1, kind: output, shape index: {}]  }
   0x1   :  { %7 = vsyncpa [#allocation4], 0 }
   0x2   :  { %9 = vsyncpa [#allocation4 + $0x1], 0  ;;  %s352_s6 = smov 0   ;;  %s354_s7 = smov 0  }
   0x3   :  { %s356_s8 = smov 0   ;;  %s358_s9 = smov 0  }
   0x4 LB: > { %s373_s10 = sadd.s32 4294967295, %s338_s9   ;;  %s184_s11 = sadd.s32 4294967294, %s338_s9   ;;  %s338_s9 = sphi %s358_s9, %s499_s9   ;;  %s334_s8 = sphi %s356_s8, %s498_s8   ;;  %s330_s7 = sphi %s354_s7, %s497_s7   ;;  %s326_s6 = sphi %s352_s6, %s496_s6  }
   0x5   : > { %s377_s12 = sadd.s32 1, %s338_s9   ;;  %s43_s13 = sadd.s32 1, %s334_s8 }
   0x6   : > { %s40_s14 = ssub.s32 %s338_s9, %s377_s12  ;;  %p53_p0 = scmp.ne.s32.totalorder %s334_s8, %s330_s7 }
   0x7   : > { %p41_p1 = scmp.eq.s32.totalorder %s40_s14, 0  ;;  %p54_p2 = scmp.eq.s32.totalorder %s373_s10, 1 }
   0x8   : > { %p59_p3 = scmp.ne.s32.totalorder %s330_s7, %s326_s6  ;;  %p60_p4 = scmp.eq.s32.totalorder %s184_s11, 1 }
   0x9   : > { %s388_s15 = scalar_select %p41_p1, %s334_s8, %s43_s13  }
   0xa   : > { %p390_p5 = por %p54_p2, %p53_p0  ;;  %p394_p6 = por %p60_p4, %p59_p3 }
   0xb   : > { %p185_p7 = scmp.ge.s32.totalorder %s338_s9, 1  ;;  %p67_p8 = scmp.lt.s32.totalorder %s338_s9, 3 }
   0xc   : > { %s487_s16 = scalar_select %p390_p5, 1, 0 }
   0xd   : > { %s488_s17 = scalar_select %p394_p6, 1, 0 }
   0xe   : > { %p484_p9 = scmp.eq.s32.totalorder %s373_s10, 0  ;;  %p401_p10 = pnand %p185_p7, %p67_p8 }
   0xf   : > { %s340_s19 = smov [#allocation2]   ;;  %s244_s24 = scalar_lea.hbm %s482_s0, 128 }
  0x10   : > { %s489_s18 = scalar_select %p401_p10, 1, 0 }
  0x11   : > { %s80_s20 = sshll.u32 %s340_s19, 4  ;;  %p200_p11 = pneg %p401_p10  ;;  %s81_s20 = int_to_ptr.vmem [resolvable:$true] %s80_s20 }
  0x12   : > { %p245_p13 = scmp.ne.s32.totalorder %s482_s0, %s244_s24  ;;  %p251_p3 = scmp.lt.u32.totalorder %s244_s24, %s482_s0 }
  0x13   : > { %p409_p12 = pnand %p484_p9, %p200_p11 }
  0x15   : > { %p246_p0 = pneg %p409_p12 }
  0x17   : > { %p247_p1 = pnand %p246_p0, %p245_p13 }
  0x19   : > { %p248_p2 = pneg %p247_p1 }
  0x1b   : > { %p253_p4 = pnand %p251_p3, %p248_p2 }
  0x1d   : > { %256 = shalt.err (!%p253_p4)
}
  0x1e   : > { %s257_s29 = scalar_lea.vmem %s81_s20, 128  ;;  %p265_p9 = scmp.lt.s32.totalorder %s81_s20, %s81_s20 }
  0x1f   : > { %p258_p7 = scmp.ne.s32.totalorder %s81_s20, %s257_s29  ;;  %p266_p6 = scmp.lt.s32.totalorder %s257_s29, %s257_s29 }
  0x21   : > { %p260_p8 = pnand %p258_p7, %p246_p0  ;;  %p267_p5 = por %p266_p6, %p265_p9 }
  0x23   : > { %p261_p11 = pneg %p260_p8 }
  0x25   : > { %p268_p10 = pnand %p267_p5, %p261_p11 }
  0x27   : > { %271 = shalt.err (!%p268_p10)
}
  0x28   : > { %203 = dma.hbm_to_vmem [thread:$0]  (!%p409_p12), %s482_s0, 128, %s81_s20, [#allocation3]  }
  0x29   : > { %p491_p13 = scmp.ne.s32.totalorder %s489_s18, 0 }
  0x2a   : > { %p492_p1 = scmp.eq.s32.totalorder (!%p491_p13), %s373_s10, 0 }
  0x2b   : > { %93 = sbr.rel (%p491_p13) target bundleno = 77 (0x4d), region = 24 }
  0x32   : > { %317 = dma.done.wait (%p492_p1), [#allocation3], 128   ;;  %p493_p0 = pmov %p492_p1 }
  0x33   : > { %s105_s3 = sand.u32 1, %s330_s7   ;;  %s191_s13 = sshll.u32 %s373_s10, 7  ;;  %v108_v0 = vld [vmem:[#allocation2] sm:$0xff] }
  0x34   : > { %319 = vsyncadd (%p493_p0), [#allocation3], 4294967168  ;;  %s189_s4 = sshll.u32 %s105_s3, 3  ;;  %v109_v1 = vmul.f32 2.0, %v108_v0  ;;  %s442_s19 = scalar_lea.hbm %s483_s1, %s191_s13 }
  0x35   : > { %s107_s5 = scalar_lea.vmem [#allocation5], %s189_s4  ;;  %s112_s20 = scalar_lea.sflag [#allocation4], %s105_s3 }
  0x36   : > { %s125_s11 = sshll.u32 %s107_s5, 4  ;;  %110 = vst [vmem:[%s107_s5] sm:$0xff] %v109_v1  ;;  %p494_p6 = scmp.ne.s32.totalorder %s487_s16, 0  ;;  %s437_s11 = int_to_ptr.vmem [resolvable:$true] %s125_s11 }
  0x37   : > { %s272_s21 = scalar_lea.vmem %s437_s11, 128  ;;  %s341_s10 = smov [#allocation5]  }
  0x38   : > { %p273_p5 = scmp.ne.s32.totalorder %s437_s11, %s272_s21  ;;  %s276_s22 = sshll.u32 %s341_s10, 4  ;;  %s277_s22 = int_to_ptr.vmem [resolvable:$false] %s276_s22 }
  0x39   : > { %s278_s23 = scalar_lea.vmem %s277_s22, 256  ;;  %p279_p12 = scmp.lt.s32.totalorder %s437_s11, %s277_s22 }
  0x3a   : > { %p274_p9 = pnand %p273_p5, %p494_p6  ;;  %p280_p2 = scmp.lt.s32.totalorder %s278_s23, %s272_s21 }
  0x3c   : > { %p275_p10 = pneg %p274_p9  ;;  %p281_p3 = por %p280_p2, %p279_p12 }
  0x3e   : > { %p282_p4 = pnand %p281_p3, %p275_p10 }
  0x40   : > { %285 = shalt.err (!%p282_p4)
}
  0x41   : > { %s286_s24 = scalar_lea.hbm %s442_s19, 128  ;;  %s290_s27 = scalar_lea.hbm %s483_s1, 256 }
  0x42   : > { %p287_p7 = scmp.ne.s32.totalorder %s442_s19, %s286_s24  ;;  %p291_p13 = scmp.lt.u32.totalorder %s442_s19, %s483_s1 }
  0x43   : > { %p292_p1 = scmp.lt.u32.totalorder %s290_s27, %s286_s24  ;;  %p294_p5 = scmp.lt.u32.totalorder %s286_s24, %s442_s19 }
  0x44   : > { %p288_p8 = pnand %p287_p7, %p494_p6 }
  0x45   : > { %p293_p0 = por %p292_p1, %p291_p13 }
  0x46   : > { %p289_p11 = pneg %p288_p8 }
  0x47   : > { %p295_p9 = por %p294_p5, %p293_p0 }
  0x49   : > { %p296_p10 = pnand %p295_p9, %p289_p11 }
  0x4b   : > { %299 = shalt.err (!%p296_p10)
}
  0x4c   : > { %198 = dma.vmem_to_hbm [thread:$0]  (%p494_p6), %s437_s11, 128, %s442_s19, %s112_s20  }
  0x4d PF: > { %p210_p12 = scmp.ge.s32.totalorder %s338_s9, 2  ;;  %s137_s30 = sand.u32 1, %s326_s6  }
  0x4e   : > { %p495_p2 = scmp.ne.s32.totalorder %s488_s17, 0  ;;  %s138_s2 = scalar_lea.sflag [#allocation4], %s137_s30 }
  0x50   : > { %p205_p3 = pnand %p210_p12, %p495_p2 }
  0x52   : > { %321 = dma.done.wait (!%p205_p3), %s138_s2, 128  }
  0x53   : > { %323 = vsyncadd (!%p205_p3), %s138_s2, 4294967168  ;;  %p12_p4 = scmp.ge.s32.totalorder %s377_s12, 4   ;;  %s496_s6 = smov %s330_s7 }
  0x54   : > { %s497_s7 = smov %s334_s8  ;;  %s498_s8 = smov %s388_s15 }
  0x55   : > { %s499_s9 = smov %s377_s12  ;;  %14 = sbr.rel (!%p12_p4) target bundleno = 4 (0x4), region = 61 }
  0x5c   :  { %143 = vsyncpa [#allocation3], 1 }
  0x5d   :  { %145 = vsyncpa [#allocation3 + $0x1], 1 }
  0x5e   :  { %146 = vsyncpa [#allocation4], 1 }
  0x5f   :  { %148 = vsyncpa [#allocation4 + $0x1], 1 }

// kernel: tpu_custom_call.1
= control target key start
LH: loop header
LB: loop body
LE: loop exit
PB: predicated region body
PF: predicated region fallthrough
CT: control target
= control target key end

     0   :  { %10 = vsyncpa [#allocation3], 0  ;;  %s1417_s0 = inlined_call_operand.hbm [shape: f32[64,256], index: 0, kind: input, shape index: {}]   ;;  %s1418_s1 = inlined_call_operand.hbm [shape: f32[256,128], index: 1, kind: input, shape index: {}]   ;;  %s1419_s2 = inlined_call_operand.vmem [shape: f32[1,128], index: 2, kind: input, shape index: {}]   ;;  %s1420_s3 = inlined_call_operand.hbm [shape: f32[128,128], index: 3, kind: input, shape index: {}]   ;;  %s1421_s4 = inlined_call_operand.vmem [shape: f32[1,128], index: 4, kind: input, shape index: {}]   ;;  %s1422_s5 = inlined_call_operand.hbm [shape: f32[64,128], index: 5, kind: output, shape index: {}]  }
   0x1   :  { %12 = vsyncpa [#allocation3 + $0x1], 0 }
   0x2   :  { %13 = vsyncpa [#allocation6], 0 }
   0x3   :  { %14 = vsyncpa [#allocation4], 0 }
   0x4   :  { %16 = vsyncpa [#allocation4 + $0x1], 0  ;;  %s1166_s18 = smov 0   ;;  %s1168_s19 = smov 0  }
   0x5   :  { %s1170_s20 = smov 0   ;;  %s1172_s21 = smov 0  }
   0x6 LB: > { %s1187_s22 = sadd.s32 4294967295, %s1124_s21   ;;  %s677_s23 = sadd.s32 4294967294, %s1124_s21   ;;  %s1124_s21 = sphi %s1172_s21, %s1442_s21   ;;  %s1120_s20 = sphi %s1170_s20, %s1441_s20   ;;  %s1116_s19 = sphi %s1168_s19, %s1440_s19   ;;  %s1112_s18 = sphi %s1166_s18, %s1439_s18  }
   0x7   : > { %p42_p0 = scmp.ne.s32.totalorder %s1116_s19, %s1112_s18  ;;  %p1423_p1 = scmp.eq.s32.totalorder %s1187_s22, 0 }
   0x8   : > { %p156_p3 = scmp.eq.s32.totalorder %s677_s23, 1  ;;  %p678_p5 = scmp.ge.s32.totalorder %s1124_s21, 1 }
   0x9   : > { %p1196_p4 = por %p1423_p1, %p42_p0  ;;  %p163_p7 = scmp.lt.s32.totalorder %s1124_s21, 3 }
   0xa   : > { %p1201_p6 = por %p156_p3, %p42_p0  ;;  %s1126_s27 = smov [#allocation5]  }
   0xb   : > { %s1426_s24 = scalar_select %p1196_p4, 1, 0 }
   0xc   : > { %s1427_s25 = scalar_select %p1201_p6, 1, 0 }
   0xd   : > { %p1206_p8 = pnand %p678_p5, %p163_p7  ;;  %s175_s28 = sshll.u32 %s1126_s27, 4  ;;  %s1210_s28 = int_to_ptr.vmem [resolvable:$true] %s175_s28 }
   0xe   : > { %s1127_s30 = smov [#allocation7]   ;;  %s968_s9 = scalar_lea.hbm %s1418_s1, 4096 }
   0xf   : > { %p883_p9 = pneg %p1206_p8  ;;  %s191_s6 = sshll.u32 %s1127_s30, 4  ;;  %s1221_s6 = int_to_ptr.vmem [resolvable:$true] %s191_s6 }
  0x10   : > { %p969_p12 = scmp.ne.s32.totalorder %s1418_s1, %s968_s9  ;;  %p975_p5 = scmp.lt.u32.totalorder %s968_s9, %s1418_s1 }
  0x11   : > { %p1217_p11 = pnand %p883_p9, %p1423_p1 }
  0x13   : > { %p970_p13 = pneg %p1217_p11 }
  0x15   : > { %p971_p0 = pnand %p970_p13, %p969_p12 }
  0x17   : > { %p972_p3 = pneg %p971_p0 }
  0x19   : > { %p977_p7 = pnand %p975_p5, %p972_p3 }
  0x1b   : > { %980 = shalt.err (!%p977_p7)
}
  0x1c   : > { %s981_s14 = scalar_lea.vmem %s1210_s28, 4096  ;;  %p989_p2 = scmp.lt.s32.totalorder %s1210_s28, %s1210_s28 }
  0x1d   : > { %p982_p9 = scmp.ne.s32.totalorder %s1210_s28, %s981_s14  ;;  %p990_p12 = scmp.lt.s32.totalorder %s981_s14, %s981_s14 }
  0x1f   : > { %p984_p10 = pnand %p982_p9, %p970_p13  ;;  %p991_p0 = por %p990_p12, %p989_p2 }
  0x21   : > { %p985_p1 = pneg %p984_p10 }
  0x23   : > { %p992_p6 = pnand %p991_p0, %p985_p1 }
  0x25   : > { %995 = shalt.err (!%p992_p6)
}
  0x26   : > { %s1128_s15 = smov 128   ;;  %s1129_s16 = smov 8  }
  0x27   : > { %886 = dma.hbm_to_vmem [thread:$0]  (!%p1217_p11), %s1418_s1, 4096, %s1210_s28, [#allocation6], %s1128_s15, %s1128_s15, %s1129_s16  }
  0x28   : > { %s996_s7 = scalar_lea.hbm %s1420_s3, 2048 }
  0x29   : > { %p997_p2 = scmp.ne.s32.totalorder %s1420_s3, %s996_s7  ;;  %p1003_p10 = scmp.lt.u32.totalorder %s996_s7, %s1420_s3 }
  0x2b   : > { %p999_p1 = pnand %p997_p2, %p970_p13 }
  0x2d   : > { %p1000_p6 = pneg %p999_p1 }
  0x2f   : > { %p1005_p3 = pnand %p1003_p10, %p1000_p6 }
  0x31   : > { %1008 = shalt.err (!%p1005_p3)
}
  0x32   : > { %s1009_s28 = scalar_lea.vmem %s1221_s6, 2048  ;;  %p1017_p12 = scmp.lt.s32.totalorder %s1221_s6, %s1221_s6 }
  0x33   : > { %p1010_p5 = scmp.ne.s32.totalorder %s1221_s6, %s1009_s28  ;;  %p1018_p0 = scmp.lt.s32.totalorder %s1009_s28, %s1009_s28 }
  0x35   : > { %p1012_p7 = pnand %p1010_p5, %p970_p13  ;;  %p1019_p2 = por %p1018_p0, %p1017_p12 }
  0x37   : > { %p1013_p9 = pneg %p1012_p7 }
  0x39   : > { %p1020_p1 = pnand %p1019_p2, %p1013_p9 }
  0x3b   : > { %1023 = shalt.err (!%p1020_p1)
}
  0x3c   : > { %889 = dma.hbm_to_vmem [thread:$0]  (!%p1217_p11), %s1420_s3, 2048, %s1221_s6, [#allocation6], %s1128_s15, %s1128_s15, %s1129_s16  }
  0x3d   : > { %s1276_s14 = sadd.s32 1, %s1124_s21   ;;  %s29_s29 = sadd.s32 1, %s1120_s20 }
  0x3e   : > { %s26_s17 = ssub.s32 %s1124_s21, %s1276_s14  ;;  %p36_p13 = scmp.ne.s32.totalorder %s1120_s20, %s1116_s19 }
  0x3f   : > { %p27_p6 = scmp.eq.s32.totalorder %s26_s17, 0  ;;  %p37_p10 = scmp.eq.s32.totalorder %s1124_s21, 0 }
  0x40   : > { %p1430_p3 = scmp.eq.s32.totalorder %s1187_s22, 1  ;;  %p900_p7 = scmp.lt.s32.totalorder %s1124_s21, 2 }
  0x41   : > { %s1292_s27 = scalar_select %p27_p6, %s1120_s20, %s29_s29  }
  0x42   : > { %p1286_p5 = por %p1430_p3, %p36_p13  ;;  %p38_p9 = por %p37_p10, %p36_p13 }
  0x43   : > { %s208_s30 = sand.u32 1, %s1120_s20   ;;  %s703_s6 = sshll.u32 %s1124_s21, 10 }
  0x44   : > { %s1431_s23 = scalar_select %p1286_p5, 1, 0 }
  0x45   : > { %s682_s7 = sshll.u32 %s208_s30, 6  ;;  %s1299_s8 = scalar_lea.hbm %s1417_s0, %s703_s6 }
  0x46   : > { %s212_s9 = scalar_lea.vmem [#allocation2], %s682_s7  ;;  %p1303_p11 = pnand %p900_p7, %p38_p9 }
  0x47   : > { %s220_s10 = sshll.u32 %s212_s9, 4  ;;  %s1307_s28 = scalar_lea.sflag [#allocation3], %s208_s30  ;;  %s1301_s10 = int_to_ptr.vmem [resolvable:$true] %s220_s10 }
  0x48   : > { %s1024_s12 = scalar_lea.hbm %s1299_s8, 1024  ;;  %p1026_p0 = pneg %p1303_p11 }
  0x49   : > { %p1025_p12 = scmp.ne.s32.totalorder %s1299_s8, %s1024_s12  ;;  %s1029_s17 = scalar_lea.hbm %s1417_s0, 2048 }
  0x4a   : > { %p1030_p13 = scmp.lt.u32.totalorder %s1299_s8, %s1417_s0  ;;  %p1031_p6 = scmp.lt.u32.totalorder %s1029_s17, %s1024_s12 }
  0x4b   : > { %p1027_p2 = pnand %p1026_p0, %p1025_p12  ;;  %p1033_p3 = scmp.lt.u32.totalorder %s1024_s12, %s1299_s8 }
  0x4c   : > { %p1032_p10 = por %p1031_p6, %p1030_p13 }
  0x4d   : > { %p1028_p1 = pneg %p1027_p2 }
  0x4e   : > { %p1034_p7 = por %p1033_p3, %p1032_p10 }
  0x50   : > { %p1035_p9 = pnand %p1034_p7, %p1028_p1 }
  0x52   : > { %1038 = shalt.err (!%p1035_p9)
}
  0x53   : > { %s1039_s30 = scalar_lea.vmem %s1301_s10, 1024  ;;  %s1130_s15 = smov [#allocation2]  }
  0x54   : > { %p1040_p12 = scmp.ne.s32.totalorder %s1301_s10, %s1039_s30  ;;  %s1044_s16 = sshll.u32 %s1130_s15, 4  ;;  %s1045_s16 = int_to_ptr.vmem [resolvable:$false] %s1044_s16 }
  0x55   : > { %s1046_s9 = scalar_lea.vmem %s1045_s16, 2048  ;;  %p1047_p4 = scmp.lt.s32.totalorder %s1301_s10, %s1045_s16 }
  0x56   : > { %p1042_p2 = pnand %p1040_p12, %p1026_p0  ;;  %p1048_p13 = scmp.lt.s32.totalorder %s1046_s9, %s1039_s30 }
  0x58   : > { %p1043_p5 = pneg %p1042_p2  ;;  %p1049_p6 = por %p1048_p13, %p1047_p4 }
  0x5a   : > { %p1050_p10 = pnand %p1049_p6, %p1043_p5 }
  0x5c   : > { %1053 = shalt.err (!%p1050_p10)
}
  0x5d   : > { %s1131_s12 = smov 256   ;;  %s1132_s13 = smov 16  }
  0x5e   : > { %893 = dma.hbm_to_vmem [thread:$0]  (!%p1303_p11), %s1299_s8, 1024, %s1301_s10, %s1307_s28, %s1131_s12, %s1131_s12, %s1132_s13  }
  0x5f   : > { %232 = sbr.rel (%p1206_p8) target bundleno = 791 (0x317), region = 40  ;;  %s1338_s29 = sand.u32 (!%p1206_p8), 1, %s1116_s19  }
  0x60   : > { %s687_s17 = sshll.u32 (!%p1206_p8), %s1338_s29, 6  ;;  %s235_s7 = scalar_lea.sflag (!%p1206_p8), [#allocation3], %s1338_s29 }
  0x61   : > { %s1342_s6 = scalar_lea.vmem (!%p1206_p8), [#allocation2], %s687_s17  ;;  %p1433_p4 = scmp.ne.s32.totalorder (!%p1206_p8), %s1426_s24, 0 }
  0x66   : > { %1099 = dma.done.wait (%p1433_p4), %s235_s7, 1024  }
  0x67   : > { %1101 = vsyncadd (%p1433_p4), %s235_s7, 4294966272  ;;  %p1434_p5 = scmp.eq.s32.totalorder %s1187_s22, 0 }
  0x69   : > { %1103 = dma.done.wait (%p1434_p5), [#allocation6], 6144   ;;  %p1435_p8 = pmov %p1434_p5 }
  0x6a   : > { %v299_v0 = vld [vmem:[#allocation5 + $0x80] sm:$0xff]  ;;  %v300_v1 = vld [vmem:[#allocation5 + $0x88] sm:$0xff]  ;;  %v301_v5 = vld [vmem:[#allocation5 + $0x90] sm:$0xff]  ;;  %s690_s11 = sshll.u32 %s1338_s29, 5  ;;  %s704_s30 = sshll.u32 %s1187_s22, 9 }
  0x6b   : > { %1105 = vsyncadd (%p1435_p8), [#allocation6], 4294961152  ;;  %v283_v2 = vld [vmem:[#allocation5] sm:$0xff]  ;;  %v807_v3 = vpack.c.bf16 %v300_v1, %v299_v0  ;;  %v284_v4 = vld [vmem:[#allocation5 + $0x8] sm:$0xff]  ;;  %s272_s28 = scalar_lea.vmem [#allocation8], %s690_s11  ;;  %s1371_s12 = scalar_lea.hbm %s1422_s5, %s704_s30 }
  0x6c   : > { %v302_v6 = vld [vmem:[#allocation5 + $0x98] sm:$0xff]  ;;  %v809_v7 = vpack.c.bf16 %v284_v4, %v283_v2  ;;  %v285_v9 = vld [vmem:[#allocation5 + $0x10] sm:$0xff]  ;;  %v303_v11 = vld [vmem:[#allocation5 + $0xa0] sm:$0xff]  ;;  %s585_s15 = sshll.u32 %s272_s28, 4  ;;  %s572_s13 = scalar_lea.sflag [#allocation4], %s1338_s29  ;;  %s1373_s15 = int_to_ptr.vmem [resolvable:$true] %s585_s15 }
  0x6d   : > { %v811_v8 = vpack.c.bf16 %v302_v6, %v301_v5  ;;  %v286_v10 = vld [vmem:[#allocation5 + $0x18] sm:$0xff]  ;;  %808 = vmatprep.subr.bf16.mxu0 %v807_v3  ;;  %v304_v12 = vld [vmem:[#allocation5 + $0xa8] sm:$0xff]  ;;  %v287_v15 = vld [vmem:[#allocation5 + $0x20] sm:$0xff]  ;;  %s1054_s17 = scalar_lea.vmem %s1373_s15, 512  ;;  %p1436_p0 = scmp.ne.s32.totalorder %s1431_s23, 0 }
  0x6e   : > { %810 = vmatpush3.bf16.msra.mxu0 %v809_v7  ;;  %v813_v13 = vpack.c.bf16 %v286_v10, %v285_v9  ;;  %v815_v14 = vpack.c.bf16 %v304_v12, %v303_v11  ;;  %v288_v16 = vld [vmem:[#allocation5 + $0x28] sm:$0xff]  ;;  %v305_v17 = vld [vmem:[#allocation5 + $0xb0] sm:$0xff]  ;;  %v306_v18 = vld [vmem:[#allocation5 + $0xb8] sm:$0xff]  ;;  %p1055_p11 = scmp.ne.s32.totalorder %s1373_s15, %s1054_s17  ;;  %s1133_s22 = smov [#allocation8]  }
  0x6f   : > { %812 = vmatprep.subr.bf16.mxu0 %v811_v8  ;;  %v817_v19 = vpack.c.bf16 %v288_v16, %v287_v15  ;;  %v819_v20 = vpack.c.bf16 %v306_v18, %v305_v17  ;;  %v289_v21 = vld [vmem:[#allocation5 + $0x30] sm:$0xff]  ;;  %v290_v22 = vld [vmem:[#allocation5 + $0x38] sm:$0xff]  ;;  %v307_v23 = vld [vmem:[#allocation5 + $0xc0] sm:$0xff]  ;;  %s1058_s7 = sshll.u32 %s1133_s22, 4  ;;  %s1059_s7 = int_to_ptr.vmem [resolvable:$false] %s1058_s7 }
  0x70   : > { %v308_v24 = vld [vmem:[#allocation5 + $0xc8] sm:$0xff]  ;;  %v821_v26 = vpack.c.bf16 %v290_v22, %v289_v21  ;;  %v291_v27 = vld [vmem:[#allocation5 + $0x40] sm:$0xff]  ;;  %v309_v30 = vld [vmem:[#allocation5 + $0xd0] sm:$0xff]  ;;  %p1056_p1 = pnand %p1055_p11, %p1436_p0  ;;  %p1061_p7 = scmp.lt.s32.totalorder %s1373_s15, %s1059_s7 }
  0x71   : > { %v276_v25 = vld [vmem:[%s1342_s6 + $0x8] sm:$0xff]  ;;  %v823_v29 = vpack.c.bf16 %v308_v24, %v307_v23  ;;  %v407_v31 = vld [vmem:[#allocation7] sm:$0xff]  ;;  %v310_v33 = vld [vmem:[#allocation5 + $0xd8] sm:$0xff] }
  0x72   : > { %814 = vmatpush3.bf16.msra.mxu0 %v813_v13  ;;  %386 = vmatprep.mubr.f32.mxu0 %v276_v25  ;;  %v292_v28 = vld [vmem:[#allocation5 + $0x48] sm:$0xff]  ;;  %v409_v35 = vld [vmem:[#allocation7 + $0x10] sm:$0xff]  ;;  %v410_v36 = vld [vmem:[#allocation7 + $0x18] sm:$0xff]  ;;  %v827_v41 = vpack.c.bf16 %v310_v33, %v309_v30  ;;  %p1057_p3 = pneg %p1056_p1 }
  0x73   : > { %816 = vmatprep.subr.bf16.mxu0 %v815_v14  ;;  %v408_v32 = vld [vmem:[#allocation7 + $0x8] sm:$0xff]  ;;  %v843_v37 = vpack.c.bf16 %v410_v36, %v409_v35  ;;  %v411_v38 = vld [vmem:[#allocation7 + $0x20] sm:$0xff]  ;;  %v825_v40 = vpack.c.bf16 %v292_v28, %v291_v27  ;;  %v293_v42 = vld [vmem:[#allocation5 + $0x50] sm:$0xff] }
  0x74   : > { %v839_v34 = vpack.c.bf16 %v408_v32, %v407_v31  ;;  %v412_v39 = vld [vmem:[#allocation7 + $0x28] sm:$0xff]  ;;  %v294_v43 = vld [vmem:[#allocation5 + $0x58] sm:$0xff]  ;;  %v311_v44 = vld [vmem:[#allocation5 + $0xe0] sm:$0xff] }
  0x75   : > { %v312_v45 = vld [vmem:[#allocation5 + $0xe8] sm:$0xff]  ;;  %v847_v46 = vpack.c.bf16 %v412_v39, %v411_v38  ;;  %v413_v47 = vld [vmem:[#allocation7 + $0x30] sm:$0xff]  ;;  %v414_v48 = vld [vmem:[#allocation7 + $0x38] sm:$0xff]  ;;  %v829_v49 = vpack.c.bf16 %v294_v43, %v293_v42 }
  0x76   : > { %818 = vmatpush3.bf16.msra.mxu0 %v817_v19  ;;  %840 = vmatprep.subr.bf16.mxu1 %v839_v34  ;;  %v831_v50 = vpack.c.bf16 %v312_v45, %v311_v44  ;;  %v295_v51 = vld [vmem:[#allocation5 + $0x60] sm:$0xff]  ;;  %v296_v52 = vld [vmem:[#allocation5 + $0x68] sm:$0xff]  ;;  %v313_v53 = vld [vmem:[#allocation5 + $0xf0] sm:$0xff]  ;;  %v851_v55 = vpack.c.bf16 %v414_v48, %v413_v47 }
  0x77   : > { %820 = vmatprep.subr.bf16.mxu0 %v819_v20  ;;  %842 = vmatpush3.bf16.msra.mxu1 %v839_v34  ;;  %v314_v54 = vld [vmem:[#allocation5 + $0xf8] sm:$0xff]  ;;  %v415_v56 = vld [vmem:[#allocation7 + $0x40] sm:$0xff]  ;;  %v416_v57 = vld [vmem:[#allocation7 + $0x48] sm:$0xff]  ;;  %v833_v58 = vpack.c.bf16 %v296_v52, %v295_v51 }
  0x78   : > { %844 = vmatprep.subr.bf16.mxu1 %v843_v37  ;;  %v835_v59 = vpack.c.bf16 %v314_v54, %v313_v53  ;;  %v297_v60 = vld [vmem:[#allocation5 + $0x70] sm:$0xff]  ;;  %v298_v61 = vld [vmem:[#allocation5 + $0x78] sm:$0xff]  ;;  %v855_v62 = vpack.c.bf16 %v416_v57, %v415_v56  ;;  %v275_v3 = vld [vmem:[%s1342_s6] sm:$0xff] }
  0x79   : > { %v417_v63 = vld [vmem:[#allocation7 + $0x50] sm:$0xff]  ;;  %v418_v0 = vld [vmem:[#allocation7 + $0x58] sm:$0xff]  ;;  %v837_v1 = vpack.c.bf16 %v298_v61, %v297_v60  ;;  %v280_v6 = vld [vmem:[%s1342_s6 + $0x28] sm:$0xff] }
  0x7a   : > { %822 = vmatpush3.bf16.msra.mxu0 %v821_v26  ;;  %v859_v2 = vpack.c.bf16 %v418_v0, %v417_v63  ;;  %v278_v4 = vld [vmem:[%s1342_s6 + $0x18] sm:$0xff]  ;;  %v277_v5 = vld [vmem:[%s1342_s6 + $0x10] sm:$0xff]  ;;  %v279_v7 = vld [vmem:[%s1342_s6 + $0x20] sm:$0xff] }
  0x7b   : > { %824 = vmatprep.subr.bf16.mxu0 %v823_v29  ;;  %846 = vmatpush3.bf16.msra.mxu1 %v843_v37  ;;  %v282_v8 = vld [vmem:[%s1342_s6 + $0x38] sm:$0xff]  ;;  %v281_v9 = vld [vmem:[%s1342_s6 + $0x30] sm:$0xff]  ;;  %v419_v10 = vld [vmem:[#allocation7 + $0x60] sm:$0xff]  ;;  %s1060_s6 = scalar_lea.vmem %s1059_s7, 1024 }
  0x7c   : > { %848 = vmatprep.subr.bf16.mxu1 %v847_v46  ;;  %v420_v11 = vld [vmem:[#allocation7 + $0x68] sm:$0xff]  ;;  %v421_v13 = vld [vmem:[#allocation7 + $0x70] sm:$0xff]  ;;  %v422_v14 = vld [vmem:[#allocation7 + $0x78] sm:$0xff]  ;;  %p1062_p9 = scmp.lt.s32.totalorder %s1060_s6, %s1054_s17 }
  0x7d   : > { %v863_v12 = vpack.c.bf16 %v420_v11, %v419_v10  ;;  %v867_v15 = vpack.c.bf16 %v422_v14, %v421_v13  ;;  %v691_v18 = vld [vmem:[%s1419_s2] ss:$0 sm:$0xff] }
  0x7e   : > { %826 = vmatpush3.bf16.msra.mxu0 %v825_v40  ;;  %v692_v33 = vld [vmem:[%s1421_s4] ss:$0 sm:$0xff]  ;;  %p1063_p12 = por %p1062_p9, %p1061_p7 }
  0x7f   : > { %828 = vmatprep.subr.bf16.mxu0 %v827_v41  ;;  %850 = vmatpush3.bf16.msra.mxu1 %v847_v46 }
  0x80   : > { %852 = vmatprep.subr.bf16.mxu1 %v851_v55  ;;  %p1064_p2 = pnand %p1063_p12, %p1057_p3 }
  0x82   : > { %830 = vmatpush3.bf16.msra.mxu0 %v829_v49 }
  0x83   : > { %832 = vmatprep.subr.bf16.mxu0 %v831_v50  ;;  %854 = vmatpush3.bf16.msra.mxu1 %v851_v55 }
  0x84   : > { %856 = vmatprep.subr.bf16.mxu1 %v855_v62 }
  0x86   : > { %834 = vmatpush3.bf16.msra.mxu0 %v833_v58 }
  0x87   : > { %836 = vmatprep.subr.bf16.mxu0 %v835_v59  ;;  %858 = vmatpush3.bf16.msra.mxu1 %v855_v62 }
  0x88   : > { %860 = vmatprep.subr.bf16.mxu1 %v859_v2 }
  0x8a   : > { %838 = vmatpush3.bf16.msra.mxu0 %v837_v1 }
  0x8b   : > { %862 = vmatpush3.bf16.msra.mxu1 %v859_v2 }
  0x8c   : > { %864 = vmatprep.subr.bf16.mxu1 %v863_v12 }
  0x8d   : > { %387 = vmatmul.mubr.f32.vlgmr.msra.gmra.mrb[0].mxu0 %v275_v3 }
  0x8e   : > { %391 = vmatprep.mubr.f32.mxu0 %v278_v4 }
  0x8f   : > { %866 = vmatpush3.bf16.msra.mxu1 %v863_v12 }
  0x90   : > { %868 = vmatprep.subr.bf16.mxu1 %v867_v15 }
  0x91   : > { %392 = vmatmul.mubr.f32.gmra.mrb[2].mxu0 %v277_v5 }
  0x92   : > { %396 = vmatprep.mubr.f32.mxu0 %v280_v6 }
  0x93   : > { %870 = vmatpush3.bf16.msra.mxu1 %v867_v15 }
  0x95   : > { %397 = vmatmul.mubr.f32.gmra.mrb[4].mxu0 %v279_v7 }
  0x96   : > { %401 = vmatprep.mubr.f32.mxu0 %v282_v8 }
  0x99   : > { %402 = vmatmul.mubr.f32.gmra.mrb[6].mxu0 %v281_v9 }
 0x160   : > { %v737_v16 = vpop.f32.mrb[0].mxu0 }
 0x161   : > { %v738_v17 = vpop.f32.mrb[1].mxu0 }
 0x162   : > { %v739_v19 = vadd.f32 %v738_v17, %v737_v16 }
 0x164   : > { %v740_v20 = vpop.f32.mrb[2].mxu0  ;;  %v389_v21 = vadd.f32 %v739_v19, %v691_v18 }
 0x165   : > { %v741_v22 = vpop.f32.mrb[3].mxu0 }
 0x166   : > { %v742_v23 = vadd.f32 %v741_v22, %v740_v20  ;;  %801 = vmatprep.mubr.f32.mxu1 %v389_v21 }
 0x168   : > { %v394_v24 = vadd.f32 %v742_v23, %v691_v18  ;;  %v743_v25 = vpop.f32.mrb[4].mxu0 }
 0x169   : > { %v744_v26 = vpop.f32.mrb[5].mxu0 }
 0x16a   : > { %v745_v27 = vadd.f32 %v744_v26, %v743_v25  ;;  %802 = vmatmul.mubr.f32.vlgmr.msra.gmra.mrb[0].mxu1 %v394_v24 }
 0x16c   : > { %v399_v28 = vadd.f32 %v745_v27, %v691_v18  ;;  %v746_v29 = vpop.f32.mrb[6].mxu0 }
 0x16d   : > { %v747_v30 = vpop.f32.mrb[7].mxu0 }
 0x16e   : > { %v748_v31 = vadd.f32 %v747_v30, %v746_v29  ;;  %804 = vmatprep.mubr.f32.mxu1 %v399_v28 }
 0x170   : > { %v404_v32 = vadd.f32 %v748_v31, %v691_v18 }
 0x172   : > { %805 = vmatmul.mubr.f32.gmra.mrb[2].mxu1 %v404_v32 }
 0x23d   : > { %v803_v34 = vpop.f32.mrb[0].mxu1 }
 0x23e   : > { %v502_v35 = vadd.f32 %v803_v34, %v692_v33  ;;  %v496_v36 = vpop.f32.mrb[1].mxu1 }
 0x23f   : > { %v497_v37 = vadd.f32 %v692_v33, %v496_v36 }
 0x240   : > { %v694_v38 = vmul.f32 -1.442695, %v502_v35 }
 0x241   : > { %v693_v39 = vmul.f32 -1.442695, %v497_v37 }
 0x242   : > { %944 = vpow2.f32 %v694_v38 }
 0x243   : > { %946 = vpow2.f32 %v693_v39 }
 0x245   : > { %v806_v40 = vpop.f32.mrb[2].mxu1 }
 0x246   : > { %v512_v41 = vadd.f32 %v806_v40, %v692_v33  ;;  %v506_v42 = vpop.f32.mrb[3].mxu1 }
 0x247   : > { %v507_v43 = vadd.f32 %v692_v33, %v506_v42 }
 0x248   : > { %v696_v44 = vmul.f32 -1.442695, %v512_v41 }
 0x249   : > { %v695_v45 = vmul.f32 -1.442695, %v507_v43 }
 0x24a   : > { %948 = vpow2.f32 %v696_v44 }
 0x24b   : > { %950 = vpow2.f32 %v695_v45 }
 0x24c   : > { %v945_v46 = vpop.eup %944 }
 0x24d   : > { %v947_v47 = vpop.eup %946  ;;  %v528_v48 = vadd.f32 1.0, %v945_v46 }
 0x24e   : > { %v527_v49 = vadd.f32 1.0, %v947_v47 }
 0x24f   : > { %952 = vrcp.f32 %v528_v48 }
 0x250   : > { %954 = vrcp.f32 %v527_v49 }
 0x254   : > { %v949_v50 = vpop.eup %948 }
 0x255   : > { %v951_v51 = vpop.eup %950  ;;  %v530_v52 = vadd.f32 1.0, %v949_v50 }
 0x256   : > { %v529_v53 = vadd.f32 1.0, %v951_v51 }
 0x257   : > { %956 = vrcp.f32 %v530_v52 }
 0x258   : > { %958 = vrcp.f32 %v529_v53 }
 0x259   : > { %v953_v54 = vpop.eup %952 }
 0x25a   : > { %v955_v55 = vpop.eup %954  ;;  %v540_v58 = vmul.f32 %v953_v54, %v394_v24 }
 0x25b   : > { %v539_v56 = vmul.f32 %v955_v55, %v389_v21 }
 0x25c   : > { %v544_v60 = vmul.f32 %v540_v58, %v540_v58 }
 0x25d   : > { %v543_v57 = vmul.f32 %v539_v56, %v539_v56 }
 0x25f   : > { %547 = vadd.xlane.f32.xlu0 %v543_v57 }
 0x261   : > { %v957_v59 = vpop.eup %956 }
 0x262   : > { %v959_v61 = vpop.eup %958  ;;  %v542_v0 = vmul.f32 %v957_v59, %v404_v32 }
 0x263   : > { %549 = vadd.xlane.f32.xlu0 %v544_v60  ;;  %v541_v62 = vmul.f32 %v959_v61, %v399_v28 }
 0x264   : > { %v546_v1 = vmul.f32 %v542_v0, %v542_v0 }
 0x265   : > { %v545_v63 = vmul.f32 %v541_v62, %v541_v62 }
 0x267   : > { %551 = vadd.xlane.f32.xlu1 %v545_v63 }
 0x26b   : > { %553 = vadd.xlane.f32.xlu1 %v546_v1 }
 0x2ec   : > { %v548_v2 = vpop.xlane.xlu0 %547 }
 0x2ed   : > { %v555_v3 = vmax.f32 %v548_v2, 1e-24 }
 0x2ef   : > { %960 = vrsqrt.f32 %v555_v3 }
 0x2f0   : > { %v550_v4 = vpop.xlane.xlu0 %549 }
 0x2f1   : > { %v556_v5 = vmax.f32 %v550_v4, 1e-24 }
 0x2f3   : > { %962 = vrsqrt.f32 %v556_v5 }
 0x2f4   : > { %v552_v6 = vpop.xlane.xlu1 %551 }
 0x2f5   : > { %v557_v7 = vmax.f32 %v552_v6, 1e-24 }
 0x2f7   : > { %964 = vrsqrt.f32 %v557_v7 }
 0x2f8   : > { %v554_v8 = vpop.xlane.xlu1 %553 }
 0x2f9   : > { %v961_v9 = vpop.eup %960  ;;  %v558_v10 = vmax.f32 %v554_v8, 1e-24 }
 0x2fa   : > { %v563_v11 = vmul.f32 %v961_v9, %v539_v56 }
 0x2fb   : > { %966 = vrsqrt.f32 %v558_v10 }
 0x2fc   : > { %567 = vst [vmem:[%s272_s28] sm:$0xff] %v563_v11 }
 0x2fd   : > { %v963_v12 = vpop.eup %962 }
 0x2fe   : > { %v564_v13 = vmul.f32 %v963_v12, %v540_v58 }
 0x300   : > { %568 = vst [vmem:[%s272_s28 + $0x8] sm:$0xff] %v564_v13 }
 0x301   : > { %v965_v14 = vpop.eup %964 }
 0x302   : > { %v565_v15 = vmul.f32 %v965_v14, %v541_v62 }
 0x304   : > { %569 = vst [vmem:[%s272_s28 + $0x10] sm:$0xff] %v565_v15 }
 0x305   : > { %v967_v16 = vpop.eup %966 }
 0x306   : > { %v566_v17 = vmul.f32 %v967_v16, %v542_v0 }
 0x308   : > { %570 = vst [vmem:[%s272_s28 + $0x18] sm:$0xff] %v566_v17 }
 0x309   : > { %1067 = shalt.err (!%p1064_p2)
}
 0x30a   : > { %s1068_s24 = scalar_lea.hbm %s1371_s12, 512  ;;  %s1072_s10 = scalar_lea.hbm %s1422_s5, 1024 }
 0x30b   : > { %p1069_p13 = scmp.ne.s32.totalorder %s1371_s12, %s1068_s24  ;;  %p1073_p4 = scmp.lt.u32.totalorder %s1371_s12, %s1422_s5 }
 0x30c   : > { %p1074_p5 = scmp.lt.u32.totalorder %s1072_s10, %s1068_s24  ;;  %p1076_p11 = scmp.lt.u32.totalorder %s1068_s24, %s1371_s12 }
 0x30d   : > { %p1070_p6 = pnand %p1069_p13, %p1436_p0 }
 0x30e   : > { %p1075_p8 = por %p1074_p5, %p1073_p4 }
 0x30f   : > { %p1071_p10 = pneg %p1070_p6 }
 0x310   : > { %p1077_p1 = por %p1076_p11, %p1075_p8 }
 0x312   : > { %p1078_p3 = pnand %p1077_p1, %p1071_p10 }
 0x314   : > { %1081 = shalt.err (!%p1078_p3)
}
 0x315   : > { %s1134_s30 = smov 128   ;;  %s1135_s16 = smov 8  }
 0x316   : > { %881 = dma.vmem_to_hbm [thread:$0]  (%p1436_p0), %s1373_s15, 512, %s1371_s12, %s572_s13, %s1134_s30, %s1134_s30, %s1135_s16  }
 0x317 PF: > { %s600_s9 = sand.u32 1, %s1112_s18   ;;  %p1437_p7 = scmp.ne.s32.totalorder %s1427_s25, 0 }
 0x318   : > { %p1438_p9 = scmp.ge.s32.totalorder %s1124_s21, 2  ;;  %s601_s17 = scalar_lea.sflag [#allocation4], %s600_s9 }
 0x31a   : > { %p895_p12 = pnand %p1438_p9, %p1437_p7 }
 0x31c   : > { %1107 = dma.done.wait (!%p895_p12), %s601_s17, 512  }
 0x31d   : > { %1109 = vsyncadd (!%p895_p12), %s601_s17, 4294966784  ;;  %p19_p2 = scmp.ge.s32.totalorder %s1276_s14, 4   ;;  %s1439_s18 = smov %s1116_s19 }
 0x31e   : > { %s1440_s19 = smov %s1120_s20  ;;  %s1441_s20 = smov %s1292_s27 }
 0x31f   : > { %s1442_s21 = smov %s1276_s14  ;;  %21 = sbr.rel (!%p19_p2) target bundleno = 6 (0x6), region = 93 }
 0x326   :  { %606 = vsyncpa [#allocation3], 1 }
 0x327   :  { %608 = vsyncpa [#allocation3 + $0x1], 1 }
 0x328   :  { %609 = vsyncpa [#allocation6], 1 }
 0x329   :  { %610 = vsyncpa [#allocation4], 1 }
 0x32a   :  { %612 = vsyncpa [#allocation4 + $0x1], 1 }

</bundles_post_ra>
